<compile_context>
chip_gen: v6e
topology: v6e:2x2x1
jax: 0.10.0
libtpu: 0.0.40
codegen_flags: <defaults>
</compile_context>

<pallas_src>
import functools

import jax
import jax.numpy as jnp
from jax import lax
from jax.experimental import pallas as pl
from jax.experimental.pallas import tpu as pltpu


# lowbias32 constants, expressed as int32 (wrapping arithmetic is bit-exact
# with the canonical uint32 formulation).
_GOLDEN_I32 = -1640531527     # 0x9E3779B9
_M1_I32 = 0x7FEB352D          # 2146121005
_M2_I32 = -2073319797         # 0x846CA68B


def _lsr(x, k):
    """Logical right shift on int32: arithmetic shift + mask of low bits."""
    return (x >> k) & ((1 << (32 - k)) - 1)


def _hash_bits_i32(idx_i32, seed_i32):
    """lowbias32 avalanche hash; output uniform over the full int32 range."""
    h = idx_i32 ^ (seed_i32 * jnp.int32(_GOLDEN_I32))
    h = (h ^ _lsr(h, 16)) * jnp.int32(_M1_I32)
    h = (h ^ _lsr(h, 15)) * jnp.int32(_M2_I32)
    return h ^ _lsr(h, 16)


def _dropout_kernel(seed_ref, x_ref, o_ref, *, threshold_i32, multiplier):
    tile_rows, lane = x_ref.shape
    row0 = pl.program_id(0) * tile_rows
    r = lax.broadcasted_iota(jnp.int32, (tile_rows, lane), 0)
    c = lax.broadcasted_iota(jnp.int32, (tile_rows, lane), 1)
    gidx = (row0 + r) * lane + c                  # global flat element index
    bits = _hash_bits_i32(gidx, seed_ref[0])
    keep = bits >= jnp.int32(threshold_i32)       # P(keep) = 1 - p
    x = x_ref[...]
    scaled = x * jnp.asarray(multiplier, x.dtype)
    o_ref[...] = jnp.where(keep, scaled, jnp.zeros_like(scaled))


_LANES = (1024, 512, 256, 128)


def _choose_layout(total, itemsize, target_block_bytes=2 * 1024 * 1024):
    """Pick (lane, rows, tile_rows, padded_total) for a lane-dense slab."""
    lane = None
    for cand in _LANES:
        if total % cand == 0:
            lane = cand
            break
    if lane is None:                      # rare: needs padding to a lane multiple
        lane = 128
        padded_total = -(-total // lane) * lane
    else:
        padded_total = total
    rows = padded_total // lane

    # Largest multiple-of-8 row tile under the per-block byte budget.
    max_tile = max(8, (target_block_bytes // (lane * itemsize)) // 8 * 8)
    if rows <= max_tile:
        tile_r = rows                     # single block; block == full array dims
    else:
        tile_r = None
        for t in range(max_tile, 0, -8):  # largest divisor of rows, multiple of 8
            if rows % t == 0:
                tile_r = t
                break
        if tile_r is None:                # fallback: pad rows to multiple of max_tile
            rows = -(-rows // max_tile) * max_tile
            padded_total = rows * lane
            tile_r = max_tile
    return lane, rows, tile_r, padded_total


def dropout(x, *, p=0.5, seed=0, training=True):
    """Dropout: keep each element with prob (1-p), scale kept by 1/(1-p)."""
    assert 0 <= p < 1, "p out of range"
    if not training:
        return x

    orig_shape = x.shape
    dtype = x.dtype
    total = int(x.size)
    itemsize = jnp.dtype(dtype).itemsize

    lane, rows, tile_r, padded_total = _choose_layout(total, itemsize)

    x_flat = x.reshape(-1)
    if padded_total != total:
        x_flat = jnp.pad(x_flat, (0, padded_total - total))
    x2d = x_flat.reshape(rows, lane)

    # keep iff bits >= threshold, with bits uniform over int32:
    # threshold = round(p * 2^32) - 2^31  ==>  P(keep) = 1 - p  (p=0 keeps all).
    threshold_i32 = int(round(p * 2.0 ** 32)) - 2 ** 31
    threshold_i32 = max(-(2 ** 31), min(2 ** 31 - 1, threshold_i32))
    multiplier = 1.0 / (1.0 - p)

    kernel = functools.partial(
        _dropout_kernel, threshold_i32=threshold_i32, multiplier=multiplier
    )
    seed_arr = jnp.asarray([seed], dtype=jnp.int32)

    out2d = pl.pallas_call(
        kernel,
        out_shape=jax.ShapeDtypeStruct((rows, lane), dtype),
        grid_spec=pltpu.PrefetchScalarGridSpec(
            num_scalar_prefetch=1,
            grid=(rows // tile_r,),
            in_specs=[pl.BlockSpec((tile_r, lane), lambda i, seed_ref: (i, 0))],
            out_specs=pl.BlockSpec((tile_r, lane), lambda i, seed_ref: (i, 0)),
        ),
        compiler_params=pltpu.CompilerParams(
            dimension_semantics=("parallel",),
            vmem_limit_bytes=32 * 1024 * 1024,
        ),
        cost_estimate=pl.CostEstimate(
            flops=2 * total,
            transcendentals=0,
            bytes_accessed=2 * total * itemsize,
        ),
    )(seed_arr, x2d)

    out_flat = out2d.reshape(-1)
    if padded_total != total:
        out_flat = out_flat[:total]
    return out_flat.reshape(orig_shape)


class Dropout:
    """Thin module-like wrapper mirroring the PyTorch spec."""

    def __init__(self, p=0.5):
        assert 0 <= p < 1, "p out of range"
        self.p = p
        self.multiplier = 1.0 / (1.0 - p)
        self.training = True

    def __call__(self, x, seed=0):
        return dropout(x, p=self.p, seed=seed, training=self.training)


if __name__ == "__main__":
    key = jax.random.PRNGKey(0)
    x = jax.random.normal(key, (2, 4, 16, 16), dtype=jnp.float32)

    p = 0.5
    seed = 1234
    mod = Dropout(p=p)
    y = jax.block_until_ready(mod(x, seed=seed))

    assert y.shape == x.shape and y.dtype == x.dtype

    # Exact reference: reproduce the stateless hash mask in plain JAX.
    mult = 1.0 / (1.0 - p)
    threshold = jnp.int32(max(-(2 ** 31),
                              min(2 ** 31 - 1, int(round(p * 2.0 ** 32)) - 2 ** 31)))
    idx = jnp.arange(x.size, dtype=jnp.int32)
    bits = _hash_bits_i32(idx, jnp.int32(seed))
    keep = (bits >= threshold).reshape(x.shape)
    expected = jnp.where(keep, x * jnp.float32(mult),
                         jnp.float32(0.0)).astype(x.dtype)
    assert bool(jnp.allclose(y, expected, rtol=1e-6, atol=1e-6))

    # Dropped elements are exactly zero; keep fraction is near 1 - p.
    assert bool(jnp.all(jnp.where(keep, True, y == 0)))
    frac_kept = float(jnp.mean(keep.astype(jnp.float32)))
    assert 0.3 < frac_kept < 0.7, f"unexpected keep fraction {frac_kept}"

    # Eval mode: identity.
    mod.training = False
    y_eval = jax.block_until_ready(mod(x, seed=seed))
    assert bool(jnp.array_equal(y_eval, x))

    print("KERNEL_OK")
</pallas_src>

<mosaic_0001>
module attributes {stable_mosaic.version = 11 : i64} {
  func.func @_dropout_kernel(%arg0: i32, %arg1: memref<1xi32, #tpu.memory_space<smem>>, %arg2: memref<2x1024xf32, #tpu.memory_space<vmem>>, %arg3: memref<2x1024xf32, #tpu.memory_space<vmem>>) attributes {dimension_semantics = [#tpu.dimension_semantics<parallel>], iteration_bounds = array<i64: 1>, scalar_prefetch = 1 : i64, scratch_operands = 0 : i64, tpu.core_type = #tpu.core_type<tc>, window_params = [{transform_indices = @transform_0, window_bounds = array<i64: 2, 1024>}, {transform_indices = @transform_1, window_bounds = array<i64: 2, 1024>}]} {
    %c2_i32 = arith.constant 2 : i32
    %0 = arith.muli %arg0, %c2_i32 : i32
    %1 = tpu.iota {dimensions = array<i32: 0>} : vector<2x1024xi32>
    %2 = tpu.iota {dimensions = array<i32: 1>} : vector<2x1024xi32>
    %3 = vector.broadcast %0 : i32 to vector<2x1024xi32>
    %4 = arith.addi %3, %1 : vector<2x1024xi32>
    %c1024_i32 = arith.constant 1024 : i32
    %5 = vector.broadcast %c1024_i32 : i32 to vector<2x1024xi32>
    %6 = arith.muli %4, %5 : vector<2x1024xi32>
    %7 = arith.addi %6, %2 : vector<2x1024xi32>
    %c0 = arith.constant 0 : index
    %8 = memref.load %arg1[%c0] : memref<1xi32, #tpu.memory_space<smem>>
    %c-1640531527_i32 = arith.constant -1640531527 : i32
    %9 = arith.muli %8, %c-1640531527_i32 : i32
    %10 = vector.broadcast %9 : i32 to vector<2x1024xi32>
    %11 = arith.xori %7, %10 : vector<2x1024xi32>
    %c16_i32 = arith.constant 16 : i32
    %12 = vector.broadcast %c16_i32 : i32 to vector<2x1024xi32>
    %13 = arith.shrsi %11, %12 : vector<2x1024xi32>
    %c65535_i32 = arith.constant 65535 : i32
    %14 = vector.broadcast %c65535_i32 : i32 to vector<2x1024xi32>
    %15 = arith.andi %13, %14 : vector<2x1024xi32>
    %16 = arith.xori %11, %15 : vector<2x1024xi32>
    %c2146121005_i32 = arith.constant 2146121005 : i32
    %17 = vector.broadcast %c2146121005_i32 : i32 to vector<2x1024xi32>
    %18 = arith.muli %16, %17 : vector<2x1024xi32>
    %c15_i32 = arith.constant 15 : i32
    %19 = vector.broadcast %c15_i32 : i32 to vector<2x1024xi32>
    %20 = arith.shrsi %18, %19 : vector<2x1024xi32>
    %c131071_i32 = arith.constant 131071 : i32
    %21 = vector.broadcast %c131071_i32 : i32 to vector<2x1024xi32>
    %22 = arith.andi %20, %21 : vector<2x1024xi32>
    %23 = arith.xori %18, %22 : vector<2x1024xi32>
    %c-2073319797_i32 = arith.constant -2073319797 : i32
    %24 = vector.broadcast %c-2073319797_i32 : i32 to vector<2x1024xi32>
    %25 = arith.muli %23, %24 : vector<2x1024xi32>
    %c16_i32_0 = arith.constant 16 : i32
    %26 = vector.broadcast %c16_i32_0 : i32 to vector<2x1024xi32>
    %27 = arith.shrsi %25, %26 : vector<2x1024xi32>
    %c65535_i32_1 = arith.constant 65535 : i32
    %28 = vector.broadcast %c65535_i32_1 : i32 to vector<2x1024xi32>
    %29 = arith.andi %27, %28 : vector<2x1024xi32>
    %30 = arith.xori %25, %29 : vector<2x1024xi32>
    %c0_i32 = arith.constant 0 : i32
    %31 = vector.broadcast %c0_i32 : i32 to vector<2x1024xi32>
    %32 = arith.cmpi sge, %30, %31 : vector<2x1024xi32>
    %c0_2 = arith.constant 0 : index
    %c0_3 = arith.constant 0 : index
    %33 = vector.load %arg2[%c0_2, %c0_3] : memref<2x1024xf32, #tpu.memory_space<vmem>>, vector<2x1024xf32>
    %cst = arith.constant 2.000000e+00 : f32
    %34 = vector.broadcast %cst : f32 to vector<2x1024xf32>
    %35 = arith.mulf %33, %34 : vector<2x1024xf32>
    %cst_4 = arith.constant 0.000000e+00 : f32
    %36 = vector.broadcast %cst_4 : f32 to vector<2x1024xf32>
    %37 = arith.select %32, %35, %36 : vector<2x1024xi1>, vector<2x1024xf32>
    %c0_5 = arith.constant 0 : index
    %c0_6 = arith.constant 0 : index
    %38 = vector.load %arg3[%c0_5, %c0_6] : memref<2x1024xf32, #tpu.memory_space<vmem>>, vector<2x1024xf32>
    tpu.vector_store %arg3[%c0_5, %c0_6], %37 {strides = array<i32>} : memref<2x1024xf32, #tpu.memory_space<vmem>>, vector<2x1024xf32>,
    return
  }
  func.func @transform_0(%arg0: i32, %arg1: memref<1xi32, #tpu.memory_space<smem>>) -> (i32, i32) {
    %c0_i32 = arith.constant 0 : i32
    %c0_i32_0 = arith.constant 0 : i32
    return %arg0, %c0_i32 : i32, i32
  }
  func.func @transform_1(%arg0: i32, %arg1: memref<1xi32, #tpu.memory_space<smem>>) -> (i32, i32) {
    %c0_i32 = arith.constant 0 : i32
    %c0_i32_0 = arith.constant 0 : i32
    return %arg0, %c0_i32 : i32, i32
  }
}

</mosaic_0001>

<bundles_post_ra>
// kernel: tpu_custom_call.1
= control target key start
LH: loop header
LB: loop body
LE: loop exit
PB: predicated region body
PF: predicated region fallthrough
CT: control target
= control target key end

     0   :  { %8 = vsyncpa [#allocation5], 0  ;;  %s388_s0 = inlined_call_operand.<no memory space> [shape: s32[1], index: 0, kind: input, shape index: {}]   ;;  %s389_s1 = inlined_call_operand.hbm [shape: f32[2,1024], index: 1, kind: input, shape index: {}]   ;;  %s390_s2 = inlined_call_operand.hbm [shape: f32[2,1024], index: 2, kind: output, shape index: {}]  }
   0x1   :  { %9 = vsyncpa [#allocation6], 0  ;;  %s341_s9 = smov [#allocation4]  }
   0x2   :  { %s16_s10 = sshll.u32 %s341_s9, 4  ;;  %s17_s10 = int_to_ptr.vmem [resolvable:$true] %s16_s10 }
   0x3   :  { %s305_s11 = scalar_lea.vmem %s17_s10, 256  ;;  %p310_p1 = scmp.lt.s32.totalorder %s17_s10, %s17_s10 }
   0x4   :  { %p306_p0 = scmp.ne.s32.totalorder %s17_s10, %s305_s11  ;;  %p311_p2 = scmp.lt.s32.totalorder %s305_s11, %s305_s11 }
   0x6   :  { %p312_p3 = por %p311_p2, %p310_p1 }
   0x8   :  { %p313_p4 = pnand %p312_p3, %p306_p0 }
   0xa   :  { %316 = shalt.err (!%p313_p4)
}
   0xb   :  { %19 = dma.hbm_to_vmem [thread:$0]  %s389_s1, 256, %s17_s10, [#allocation5]  }
   0xc   :  { %337 = dma.done.wait [#allocation5], 256  }
   0xd   :  { %338 = vsyncadd [#allocation5], 4294967040  ;;  %v24_v0 = vlaneseq  ;;  %s47_s16 = smul.u32 2654435769, %s388_s0  ;;  %v342_v1 = vmov 1983009808  }
   0xe   :  { %v161_v2 = vunpack.c.l.s4 %v342_v1  ;;  %v153_v19 = vld [vmem:[#allocation4] sm:$0xff]  ;;  %s343_s0 = smov [#allocation7]  }
   0xf   :  { %v25_v3 = vshrl.u32 %v24_v0, 7  ;;  %v27_v4 = vand.u32 127, %v24_v0  ;;  %v48_v5 = vstv %s47_s16  ;;  %v155_v28 = vmul.f32 2.0, %v153_v19  ;;  %s261_s1 = sshll.u32 %s343_s0, 4  ;;  %s262_s1 = int_to_ptr.vmem [resolvable:$true] %s261_s1 }
  0x10   :  { %v162_v6 = vunpack.c.0.s8 %v161_v2  ;;  %s317_s17 = scalar_lea.vmem %s262_s1, 256  ;;  %p322_p6 = scmp.lt.s32.totalorder %s262_s1, %s262_s1 }
  0x11   :  { %v28_v7 = vadd.s32 128, %v27_v4  ;;  %v29_v8 = vadd.s32 256, %v27_v4  ;;  %v30_v9 = vadd.s32 384, %v27_v4  ;;  %v37_v10 = vmul.u32 1024, %v25_v3  ;;  %p318_p5 = scmp.ne.s32.totalorder %s262_s1, %s317_s17  ;;  %p323_p7 = scmp.lt.s32.totalorder %s317_s17, %s317_s17 }
  0x12   :  { %v365_v11 = vsub.s32 %v162_v6, %v25_v3  ;;  %v31_v12 = vadd.s32 512, %v27_v4  ;;  %v32_v13 = vadd.s32 640, %v27_v4  ;;  %v33_v14 = vadd.s32 768, %v27_v4 }
  0x13   :  { %v38_v15 = vadd.s32 %v37_v10, %v27_v4  ;;  %v39_v16 = vadd.s32 %v37_v10, %v28_v7  ;;  %v40_v17 = vadd.s32 %v37_v10, %v29_v8  ;;  %v41_v18 = vadd.s32 %v37_v10, %v30_v9  ;;  %p324_p8 = por %p323_p7, %p322_p6 }
  0x14   :  { %v34_v20 = vadd.s32 896, %v27_v4  ;;  %v42_v21 = vadd.s32 %v37_v10, %v31_v12  ;;  %v43_v22 = vadd.s32 %v37_v10, %v32_v13  ;;  %v44_v23 = vadd.s32 %v37_v10, %v33_v14 }
  0x15   :  { %v49_v24 = vxor.u32 %v48_v5, %v38_v15  ;;  %v50_v25 = vxor.u32 %v48_v5, %v39_v16  ;;  %v51_v26 = vxor.u32 %v48_v5, %v40_v17  ;;  %v52_v27 = vxor.u32 %v48_v5, %v41_v18  ;;  %p325_p9 = pnand %p324_p8, %p318_p5 }
  0x16   :  { %v45_v29 = vadd.s32 %v37_v10, %v34_v20  ;;  %v53_v30 = vxor.u32 %v48_v5, %v42_v21  ;;  %v54_v31 = vxor.u32 %v48_v5, %v43_v22  ;;  %v159_v36 = vcombine.high %v155_v28, %v155_v28 }
  0x17   :  { %v270_v32 = vshrl.u32 %v49_v24, 16  ;;  %v271_v33 = vshrl.u32 %v50_v25, 16  ;;  %v272_v34 = vshrl.u32 %v51_v26, 16  ;;  %v273_v35 = vshrl.u32 %v52_v27, 16 }
  0x18   :  { %v368_v37 = vrot.slane %v155_v28, %v365_v11  ;;  %v55_v38 = vxor.u32 %v48_v5, %v44_v23  ;;  %v56_v39 = vxor.u32 %v48_v5, %v45_v29  ;;  %v371_v44 = vrot.slane %v159_v36, %v365_v11 }
  0x19   :  { %v73_v40 = vxor.u32 %v270_v32, %v49_v24  ;;  %v74_v41 = vxor.u32 %v271_v33, %v50_v25  ;;  %v75_v42 = vxor.u32 %v272_v34, %v51_v26  ;;  %v76_v43 = vxor.u32 %v273_v35, %v52_v27 }
  0x1a   :  { %v174_v45 = vcombine.high %v368_v37, %v368_v37  ;;  %v274_v46 = vshrl.u32 %v53_v30, 16  ;;  %v275_v47 = vshrl.u32 %v54_v31, 16  ;;  %v276_v50 = vshrl.u32 %v55_v38, 16 }
  0x1b   :  { %v81_v48 = vmul.u32 2146121005, %v73_v40  ;;  %v82_v49 = vmul.u32 2146121005, %v74_v41  ;;  %v277_v51 = vshrl.u32 %v56_v39, 16  ;;  %v175_v54 = vcombine.high %v371_v44, %v371_v44 }
  0x1c   :  { %v83_v52 = vmul.u32 2146121005, %v75_v42  ;;  %v84_v53 = vmul.u32 2146121005, %v76_v43  ;;  %v77_v55 = vxor.u32 %v274_v46, %v53_v30  ;;  %v78_v58 = vxor.u32 %v275_v47, %v54_v31 }
  0x1d   :  { %v278_v56 = vshrl.u32 %v81_v48, 15  ;;  %v279_v57 = vshrl.u32 %v82_v49, 15  ;;  %v79_v59 = vxor.u32 %v276_v50, %v55_v38  ;;  %v80_v62 = vxor.u32 %v277_v51, %v56_v39  ;;  %v154_v38 = vld [vmem:[#allocation4 + $0x8] sm:$0xff] }
  0x1e   :  { %v280_v60 = vshrl.u32 %v83_v52, 15  ;;  %v281_v61 = vshrl.u32 %v84_v53, 15  ;;  %v85_v63 = vmul.u32 2146121005, %v77_v55  ;;  %v86_v2 = vmul.u32 2146121005, %v78_v58 }
  0x1f   :  { %v105_v0 = vxor.u32 %v278_v56, %v81_v48  ;;  %v106_v1 = vxor.u32 %v279_v57, %v82_v49  ;;  %v87_v3 = vmul.u32 2146121005, %v79_v59  ;;  %v88_v6 = vmul.u32 2146121005, %v80_v62 }
  0x20   :  { %v107_v4 = vxor.u32 %v280_v60, %v83_v52  ;;  %v108_v5 = vxor.u32 %v281_v61, %v84_v53  ;;  %v282_v7 = vshrl.u32 %v85_v63, 15  ;;  %v283_v10 = vshrl.u32 %v86_v2, 15 }
  0x21   :  { %v113_v8 = vmul.u32 2221647499, %v105_v0  ;;  %v114_v9 = vmul.u32 2221647499, %v106_v1  ;;  %v284_v12 = vshrl.u32 %v87_v3, 15  ;;  %v285_v15 = vshrl.u32 %v88_v6, 15 }
  0x22   :  { %v115_v13 = vmul.u32 2221647499, %v107_v4  ;;  %v116_v14 = vmul.u32 2221647499, %v108_v5  ;;  %v109_v16 = vxor.u32 %v282_v7, %v85_v63  ;;  %v110_v19 = vxor.u32 %v283_v10, %v86_v2 }
  0x23   :  { %v286_v17 = vshrl.u32 %v113_v8, 16  ;;  %v287_v18 = vshrl.u32 %v114_v9, 16  ;;  %v111_v20 = vxor.u32 %v284_v12, %v87_v3  ;;  %v112_v23 = vxor.u32 %v285_v15, %v88_v6 }
  0x24   :  { %v288_v21 = vshrl.u32 %v115_v13, 16  ;;  %v289_v22 = vshrl.u32 %v116_v14, 16  ;;  %v117_v24 = vmul.u32 2221647499, %v109_v16  ;;  %v118_v27 = vmul.u32 2221647499, %v110_v19 }
  0x25   :  { %v137_v25 = vxor.u32 %v286_v17, %v113_v8  ;;  %v138_v26 = vxor.u32 %v287_v18, %v114_v9  ;;  %v119_v28 = vmul.u32 2221647499, %v111_v20  ;;  %v120_v31 = vmul.u32 2221647499, %v112_v23 }
  0x26   :  { %v139_v29 = vxor.u32 %v288_v21, %v115_v13  ;;  %v140_v30 = vxor.u32 %v289_v22, %v116_v14  ;;  %v290_v32 = vshrl.u32 %v117_v24, 16  ;;  %v291_v33 = vshrl.u32 %v118_v27, 16 }
  0x27   :  { %vm145_vm0 = vcmp.ge.s32.totalorder %v137_v25, 0  ;;  %vm146_vm1 = vcmp.ge.s32.totalorder %v138_v26, 0  ;;  %v292_v34 = vshrl.u32 %v119_v28, 16  ;;  %v293_v42 = vshrl.u32 %v120_v31, 16 }
  0x28   :  { %vm147_vm2 = vcmp.ge.s32.totalorder %v139_v29, 0  ;;  %vm148_vm3 = vcmp.ge.s32.totalorder %v140_v30, 0  ;;  %v201_v35 = vsel %vm145_vm0, %v368_v37, 0.0  ;;  %v202_v36 = vsel %vm146_vm1, %v174_v45, 0.0 }
  0x29   :  { %v203_v39 = vsel %vm147_vm2, %v371_v44, 0.0  ;;  %v204_v40 = vsel %vm148_vm3, %v175_v54, 0.0  ;;  %v217_v41 = vcombine.low %v201_v35, %v202_v36  ;;  %v141_v46 = vxor.u32 %v290_v32, %v117_v24 }
  0x2a   :  { %v218_v43 = vcombine.low %v203_v39, %v204_v40  ;;  %v142_v47 = vxor.u32 %v291_v33, %v118_v27  ;;  %v143_v48 = vxor.u32 %v292_v34, %v119_v28  ;;  %v156_v50 = vmul.f32 2.0, %v154_v38 }
  0x2b   :  { %v225_v49 = vrot.slane %v217_v41, %v365_v11  ;;  %v144_v52 = vxor.u32 %v293_v42, %v120_v31  ;;  %vm149_vm4 = vcmp.ge.s32.totalorder %v141_v46, 0 }
  0x2c   :  { %v232_v51 = vrot.slane %v218_v43, %v365_v11  ;;  %v176_v53 = vcombine.high %v156_v50, %v156_v50  ;;  %v183_v37 = vrot.slane %v156_v50, %v365_v11  ;;  %vm150_vm5 = vcmp.ge.s32.totalorder %v142_v47, 0 }
  0x2d   :  { %vm151_vm6 = vcmp.ge.s32.totalorder %v143_v48, 0  ;;  %vm152_vm7 = vcmp.ge.s32.totalorder %v144_v52, 0 }
  0x2e   :  { %v233_v45 = vcombine.low %v225_v49, %v232_v51  ;;  %v190_v44 = vrot.slane %v176_v53, %v365_v11  ;;  %v191_v54 = vcombine.high %v183_v37, %v183_v37  ;;  %v205_v55 = vsel %vm149_vm4, %v183_v37, 0.0 }
  0x30   :  { %253 = vst [vmem:[#allocation7] sm:$0xff] %v233_v45  ;;  %v192_v56 = vcombine.high %v190_v44, %v190_v44  ;;  %v206_v57 = vsel %vm150_vm5, %v191_v54, 0.0  ;;  %v207_v58 = vsel %vm151_vm6, %v190_v44, 0.0 }
  0x31   :  { %v234_v59 = vcombine.low %v205_v55, %v206_v57 }
  0x32   :  { %v208_v60 = vsel %vm152_vm7, %v192_v56, 0.0 }
  0x33   :  { %v235_v61 = vcombine.low %v207_v58, %v208_v60  ;;  %v242_v62 = vrot.slane %v234_v59, %v365_v11 }
  0x35   :  { %v249_v63 = vrot.slane %v235_v61, %v365_v11 }
  0x37   :  { %v250_v0 = vcombine.low %v242_v62, %v249_v63 }
  0x39   :  { %254 = vst [vmem:[#allocation7 + $0x8] sm:$0xff] %v250_v0 }
  0x3a   :  { %328 = shalt.err (!%p325_p9)
}
  0x3b   :  { %264 = dma.vmem_to_hbm [thread:$0]  %s262_s1, 256, %s390_s2, [#allocation6]  }
  0x3c   :  { %339 = dma.done.wait [#allocation6], 256  }
  0x3d   :  { %340 = vsyncadd [#allocation6], 4294967040 }
  0x3e   :  { %268 = vsyncpa [#allocation5], 1 }
  0x3f   :  { %269 = vsyncpa [#allocation6], 1 }

</bundles_post_ra>
